<compile_context>
chip_gen: v7x
topology: tpu7x:2x2x1
jax: 0.10.0
libtpu: 0.0.40
codegen_flags: <defaults>
</compile_context>

<pallas_src>
import numpy as np
import jax
import jax.numpy as jnp
from jax.experimental import pallas as pl
from jax.experimental.pallas import tpu as pltpu

_MIB = 1 << 20
_LANES = 128


# ----------------------------------------------------------------------------
# Weight construction
# ----------------------------------------------------------------------------
def haar_subband_weights(c: int, num_dec: int, dtype=jnp.float32):
    """Fused per-subband weights: (W_L, [W_H1, ..., W_Hnum_dec]).

    W_L  : (c, c // 2**num_dec)  -> final low-pass band
    W_Hi : (c, c // 2**i)        -> high-pass band emitted at level i
    Each is the product of the per-level one-step Haar matrices, so a single
    matmul per subband reproduces DWTHaar.dwt1d applied i times:
      L = sqrt(2)/2 * (x_even + x_odd),  H = sqrt(2)/2 * (x_even - x_odd).
    """
    assert c % (2 ** num_dec) == 0, "c must be divisible by 2**num_dec"
    s = np.sqrt(2.0) / 2.0
    carry = np.eye(c, dtype=np.float64)   # maps original x -> current L slab
    h_weights = []
    ci = c
    for _ in range(num_dec):
        half = ci // 2
        wl = np.zeros((ci, half), dtype=np.float64)
        wh = np.zeros((ci, half), dtype=np.float64)
        for k in range(half):
            wl[2 * k, k] = s
            wl[2 * k + 1, k] = s
            wh[2 * k, k] = s
            wh[2 * k + 1, k] = -s
        h_weights.append(jnp.asarray(carry @ wh, dtype=dtype))
        carry = carry @ wl
        ci = half
    w_l = jnp.asarray(carry, dtype=dtype)
    return w_l, h_weights


def _fused_layout(c: int, num_dec: int, dtype):
    """Concat weight + per-band placement.

    Column order of w_cat: all 128-multiple-wide ("wide") bands first, then
    the narrow bands packed at the end.  Returns
      (w_cat, widths, wide_idx, narrow_idx, col_off, group_widths)
    where band index 0 is L and bands 1..num_dec are H_1..H_num_dec.
    """
    w_l, w_hs = haar_subband_weights(c, num_dec, dtype)
    band_weights = [w_l] + w_hs
    widths = [int(w.shape[1]) for w in band_weights]
    n_bands = len(band_weights)
    wide = [i for i in range(n_bands) if widths[i] % _LANES == 0]
    narrow = [i for i in range(n_bands) if widths[i] % _LANES != 0]
    order = wide + narrow
    w_cat = jnp.concatenate([band_weights[i] for i in order], axis=1)
    col_off = {}
    off = 0
    for i in order:
        col_off[i] = off
        off += widths[i]
    assert off == c
    group_widths = [widths[i] for i in wide]
    if narrow:
        group_widths.append(sum(widths[i] for i in narrow))
    return w_cat, widths, wide, narrow, col_off, group_widths


# ----------------------------------------------------------------------------
# Generation-aware sizing helpers
# ----------------------------------------------------------------------------
def _vmem_capacity_bytes() -> int:
    try:
        info = pltpu.get_tpu_info()
        cap = getattr(info, "vmem_capacity_bytes", None)
        if cap:
            return int(cap)
    except Exception:
        pass
    return 64 * _MIB   # conservative default (v7x per-core VMEM)


def _num_tensorcores() -> int:
    try:
        info = pltpu.get_tpu_info()
    except Exception:
        return 1
    for attr in ("num_cores", "num_tensorcores", "tensorcore_count",
                 "cores_per_chip"):
        v = getattr(info, attr, None)
        if isinstance(v, int) and 0 < v <= 16:
            return v
    return 1


def _fused_row_tile(R: int, C: int, itemsize: int, vmem_limit: int) -> int:
    """Row tile from available VMEM (pessimistically double-buffered weights)."""
    weight_budget = 2 * C * C * itemsize
    avail = vmem_limit - weight_budget - 2 * _MIB
    per_row = 4 * C * itemsize          # x tile + all outputs, double-buffered
    tr = avail // per_row
    tr = min(tr, (8 * _MIB) // (C * itemsize))   # ~8 MiB x tile is plenty
    tr = max(8, (int(tr) // 8) * 8)
    if tr >= R:
        cores = _num_tensorcores()
        if cores > 1 and R >= 8 * cores:
            # Give each TensorCore at least one tile on the "parallel" axis.
            tr = ((-(-R // cores) + 7) // 8) * 8
            if tr >= R:
                tr = R
        else:
            tr = R   # single TC: one full block, no per-step overhead
    return int(tr)


# ----------------------------------------------------------------------------
# Kernels
# ----------------------------------------------------------------------------
def _make_grouped_kernel(group_offsets):
    """One dot with N=C, then write lane-aligned column slices per output."""
    def kernel(x_ref, w_ref, *o_refs):
        y = jnp.dot(x_ref[...], w_ref[...], preferred_element_type=jnp.float32)
        for k, o_ref in enumerate(o_refs):
            lo, hi = group_offsets[k], group_offsets[k + 1]
            o_ref[...] = y[:, lo:hi].astype(o_ref.dtype)
    return kernel


def _ntiled_kernel(x_ref, w_ref, o_ref):
    o_ref[...] = jnp.dot(
        x_ref[...], w_ref[...], preferred_element_type=jnp.float32
    ).astype(o_ref.dtype)


# ----------------------------------------------------------------------------
# Forward pass
# ----------------------------------------------------------------------------
def dwt_haar_forward(x: jnp.ndarray, num_dec: int, *, row_tile=None):
    """Pallas equivalent of DWTHaar(num_dec).forward(x).

    x: (b, n, c) -> (x_l, [h_1, ..., h_num_dec])
    x_l: (b, n, c / 2**num_dec),  h_i: (b, n, c / 2**i)
    """
    assert num_dec >= 1
    b, n, c = x.shape
    itemsize = jnp.dtype(x.dtype).itemsize
    R = b * n
    x2d = x.reshape(R, c)                 # metadata-only reshape

    w_cat, widths, wide, narrow, col_off, group_widths = _fused_layout(
        c, num_dec, x.dtype)

    cap = _vmem_capacity_bytes()
    vmem_limit = 48 * _MIB if cap <= 64 * _MIB else 64 * _MIB
    weight_budget = 2 * c * c * itemsize   # pessimistic (double-buffered)
    use_fused = weight_budget <= vmem_limit // 2

    cost = pl.CostEstimate(
        flops=2 * R * c * c,
        bytes_accessed=(2 * R * c + c * c) * itemsize,
        transcendentals=0,
    )

    if use_fused:
        if row_tile is not None:
            tr = min(int(row_tile), R)
            if tr < R:
                tr = max(8, (tr // 8) * 8)
        else:
            tr = _fused_row_tile(R, c, itemsize, vmem_limit)
        grid = (pl.cdiv(R, tr),)

        offsets = [0]
        for gw in group_widths:
            offsets.append(offsets[-1] + gw)
        kernel = _make_grouped_kernel(tuple(offsets))

        out_shape = [jax.ShapeDtypeStruct((R, gw), x.dtype)
                     for gw in group_widths]
        out_specs = [pl.BlockSpec((tr, gw), lambda i: (i, 0))
                     for gw in group_widths]

        def _run(single_buffer_weights: bool):
            if single_buffer_weights:
                w_spec = pl.BlockSpec((c, c), lambda i: (0, 0),
                                      pipeline_mode=pl.Buffered(1))
            else:
                w_spec = pl.BlockSpec((c, c), lambda i: (0, 0))
            in_specs = [pl.BlockSpec((tr, c), lambda i: (i, 0)), w_spec]
            return pl.pallas_call(
                kernel,
                out_shape=out_shape,
                grid=grid,
                in_specs=in_specs,
                out_specs=out_specs,
                compiler_params=pltpu.CompilerParams(
                    dimension_semantics=("parallel",),
                    vmem_limit_bytes=vmem_limit,
                ),
                cost_estimate=cost,
            )(x2d, w_cat)

        try:
            outs = _run(True)
        except Exception:
            # TODO(synk): pl.Buffered(1) single-buffering rejected by this JAX
            # build; fall back to default double-buffered weights.
            outs = _run(False)

        band = {}
        for k, i in enumerate(wide):
            band[i] = outs[k]
        if narrow:
            packed = outs[len(wide)]
            base = sum(widths[i] for i in wide)
            for i in narrow:
                off = col_off[i] - base
                band[i] = packed[:, off:off + widths[i]]
    else:
        # Large-C fallback: tile the weight/output N dimension so only a
        # (C, tn) weight slice is resident.  Output is one concatenated slab,
        # sliced per subband in the wrapper.
        tn = ((4 * _MIB) // (2 * c * itemsize) // _LANES) * _LANES
        tn = int(max(_LANES, min(tn, c)))
        if row_tile is not None:
            tr = min(int(row_tile), R)
            if tr < R:
                tr = max(8, (tr // 8) * 8)
        else:
            avail = vmem_limit - 2 * c * tn * itemsize - 2 * _MIB
            per_row = 2 * (c + tn) * itemsize
            tr = min(avail // per_row, (8 * _MIB) // (c * itemsize))
            tr = max(8, (int(tr) // 8) * 8)
            if tr >= R:
                tr = R
        grid = (pl.cdiv(R, tr), pl.cdiv(c, tn))

        out = pl.pallas_call(
            _ntiled_kernel,
            out_shape=jax.ShapeDtypeStruct((R, c), x.dtype),
            grid=grid,
            in_specs=[pl.BlockSpec((tr, c), lambda i, j: (i, 0)),
                      pl.BlockSpec((c, tn), lambda i, j: (0, j))],
            out_specs=pl.BlockSpec((tr, tn), lambda i, j: (i, j)),
            compiler_params=pltpu.CompilerParams(
                dimension_semantics=("parallel", "arbitrary"),
                vmem_limit_bytes=vmem_limit,
            ),
            cost_estimate=cost,
        )(x2d, w_cat)
        band = {i: out[:, col_off[i]:col_off[i] + widths[i]]
                for i in range(num_dec + 1)}

    x_l = band[0].reshape(b, n, widths[0])
    x_h = [band[i].reshape(b, n, widths[i]) for i in range(1, num_dec + 1)]
    return x_l, x_h


# ----------------------------------------------------------------------------
# Pure-JAX reference (mirrors the PyTorch module) + self-test
# ----------------------------------------------------------------------------
def dwt_haar_reference(x: jnp.ndarray, num_dec: int):
    def dwt1d(v):
        x01 = v[:, :, 0::2] / 2
        x02 = v[:, :, 1::2] / 2
        return (2 ** 0.5) * (x01 + x02), (2 ** 0.5) * (x01 - x02)

    x_iter = x
    x_h = []
    x_l = None
    for i in range(num_dec):
        l, h = dwt1d(x_iter)
        x_h.append(h)
        if i == num_dec - 1:
            x_l = l
        else:
            x_iter = l
    return x_l, x_h


def _check(b, n, c, num_dec, row_tile=None):
    key = jax.random.PRNGKey(0)
    x = jax.random.normal(key, (b, n, c), dtype=jnp.float32)

    x_l, x_h = dwt_haar_forward(x, num_dec, row_tile=row_tile)
    x_l = jax.block_until_ready(x_l)
    x_h = [jax.block_until_ready(h) for h in x_h]

    ref_l, ref_h = dwt_haar_reference(x, num_dec)
    assert x_l.shape == (b, n, c // 2 ** num_dec)
    assert len(x_h) == num_dec
    np.testing.assert_allclose(np.asarray(x_l), np.asarray(ref_l),
                               rtol=1e-5, atol=1e-5)
    for hh, rh in zip(x_h, ref_h):
        assert hh.shape == rh.shape
        np.testing.assert_allclose(np.asarray(hh), np.asarray(rh),
                                   rtol=1e-5, atol=1e-5)


if __name__ == "__main__":
    # Small shape matching dwt1d's (b, n, c) layout; all subbands < 128 lanes.
    _check(b=2, n=8, c=32, num_dec=2)
    # Mixed wide (H1=128) / narrow (L=32, H2=64, H3=32) bands plus a ragged
    # last row tile (R=150 with tile 64 -> 64 + 64 + 22).
    _check(b=3, n=50, c=256, num_dec=3, row_tile=64)
    # All subband widths are 128-multiples -> every output lane-dense,
    # zero wrapper-side slicing.
    _check(b=2, n=20, c=512, num_dec=2)

    print("KERNEL_OK")
</pallas_src>

<mosaic_0001>
module attributes {stable_mosaic.version = 11 : i64} {
  func.func @kernel(%arg0: i32, %arg1: memref<16x32xf32, #tpu.memory_space<vmem>>, %arg2: memref<32x32xf32, #tpu.memory_space<vmem>>, %arg3: memref<16x32xf32, #tpu.memory_space<vmem>>) attributes {dimension_semantics = [#tpu.dimension_semantics<parallel>], iteration_bounds = array<i64: 1>, scalar_prefetch = 0 : i64, scratch_operands = 0 : i64, tpu.core_type = #tpu.core_type<tc>, window_params = [{transform_indices = @transform_0, window_bounds = array<i64: 16, 32>}, {pipeline_mode = #tpu.pipeline_mode<synchronous>, transform_indices = @transform_1, window_bounds = array<i64: 32, 32>}, {transform_indices = @transform_2, window_bounds = array<i64: 16, 32>}]} {
    %c0 = arith.constant 0 : index
    %c0_0 = arith.constant 0 : index
    %0 = vector.load %arg1[%c0, %c0_0] : memref<16x32xf32, #tpu.memory_space<vmem>>, vector<16x32xf32>
    %c0_1 = arith.constant 0 : index
    %c0_2 = arith.constant 0 : index
    %1 = vector.load %arg2[%c0_1, %c0_2] : memref<32x32xf32, #tpu.memory_space<vmem>>, vector<32x32xf32>
    %cst = arith.constant dense<0.000000e+00> : vector<16x32xf32>
    %2 = tpu.matmul %0, %1, %cst {dimension_numbers = #tpu.dot_dimension_numbers<[1], [0], [0], [1], [0, 0, 1, 1], [], []>} : vector<16x32xf32>, vector<32x32xf32>, vector<16x32xf32> -> vector<16x32xf32>
    %c0_3 = arith.constant 0 : index
    %c0_4 = arith.constant 0 : index
    %3 = vector.load %arg3[%c0_3, %c0_4] : memref<16x32xf32, #tpu.memory_space<vmem>>, vector<16x32xf32>
    tpu.vector_store %arg3[%c0_3, %c0_4], %2 {strides = array<i32>} : memref<16x32xf32, #tpu.memory_space<vmem>>, vector<16x32xf32>,
    return
  }
  func.func @transform_0(%arg0: i32) -> (i32, i32) {
    %c0_i32 = arith.constant 0 : i32
    %c0_i32_0 = arith.constant 0 : i32
    return %arg0, %c0_i32 : i32, i32
  }
  func.func @transform_1(%arg0: i32) -> (i32, i32) {
    %c0_i32 = arith.constant 0 : i32
    %c0_i32_0 = arith.constant 0 : i32
    %c0_i32_1 = arith.constant 0 : i32
    return %c0_i32, %c0_i32_0 : i32, i32
  }
  func.func @transform_2(%arg0: i32) -> (i32, i32) {
    %c0_i32 = arith.constant 0 : i32
    %c0_i32_0 = arith.constant 0 : i32
    return %arg0, %c0_i32 : i32, i32
  }
}

module attributes {stable_mosaic.version = 11 : i64} {
  func.func @kernel(%arg0: i32, %arg1: memref<16x32xf32, #tpu.memory_space<vmem>>, %arg2: memref<32x32xf32, #tpu.memory_space<vmem>>, %arg3: memref<16x32xf32, #tpu.memory_space<vmem>>) attributes {dimension_semantics = [#tpu.dimension_semantics<parallel>], iteration_bounds = array<i64: 1>, scalar_prefetch = 0 : i64, scratch_operands = 0 : i64, tpu.core_type = #tpu.core_type<tc>, window_params = [{transform_indices = @transform_0, window_bounds = array<i64: 16, 32>}, {pipeline_mode = #tpu.pipeline_mode<synchronous>, transform_indices = @transform_1, window_bounds = array<i64: 32, 32>}, {transform_indices = @transform_2, window_bounds = array<i64: 16, 32>}]} {
    %c0 = arith.constant 0 : index
    %c0_0 = arith.constant 0 : index
    %0 = vector.load %arg1[%c0, %c0_0] : memref<16x32xf32, #tpu.memory_space<vmem>>, vector<16x32xf32>
    %c0_1 = arith.constant 0 : index
    %c0_2 = arith.constant 0 : index
    %1 = vector.load %arg2[%c0_1, %c0_2] : memref<32x32xf32, #tpu.memory_space<vmem>>, vector<32x32xf32>
    %cst = arith.constant dense<0.000000e+00> : vector<16x32xf32>
    %2 = tpu.matmul %0, %1, %cst {dimension_numbers = #tpu.dot_dimension_numbers<[1], [0], [0], [1], [0, 0, 1, 1], [], []>} : vector<16x32xf32>, vector<32x32xf32>, vector<16x32xf32> -> vector<16x32xf32>
    %c0_3 = arith.constant 0 : index
    %c0_4 = arith.constant 0 : index
    %3 = vector.load %arg3[%c0_3, %c0_4] : memref<16x32xf32, #tpu.memory_space<vmem>>, vector<16x32xf32>
    tpu.vector_store %arg3[%c0_3, %c0_4], %2 {strides = array<i32>} : memref<16x32xf32, #tpu.memory_space<vmem>>, vector<16x32xf32>,
    return
  }
  func.func @transform_0(%arg0: i32) -> (i32, i32) {
    %c0_i32 = arith.constant 0 : i32
    %c0_i32_0 = arith.constant 0 : i32
    return %arg0, %c0_i32 : i32, i32
  }
  func.func @transform_1(%arg0: i32) -> (i32, i32) {
    %c0_i32 = arith.constant 0 : i32
    %c0_i32_0 = arith.constant 0 : i32
    %c0_i32_1 = arith.constant 0 : i32
    return %c0_i32, %c0_i32_0 : i32, i32
  }
  func.func @transform_2(%arg0: i32) -> (i32, i32) {
    %c0_i32 = arith.constant 0 : i32
    %c0_i32_0 = arith.constant 0 : i32
    return %arg0, %c0_i32 : i32, i32
  }
}

</mosaic_0001>

<bundles_post_ra>
// kernel: tpu_custom_call.1
= control target key start
LH: loop header
LB: loop body
LE: loop exit
PB: predicated region body
PF: predicated region fallthrough
CT: control target
= control target key end

     0   :  { %7 = vsyncpa [#allocation3], 0  ;;  %s321_s0 = inlined_call_operand.hbm [shape: f32[16,32], index: 0, kind: input, shape index: {}]   ;;  %s322_s1 = inlined_call_operand.hbm [shape: f32[32,32], index: 1, kind: input, shape index: {}]   ;;  %s323_s2 = inlined_call_operand.hbm [shape: f32[16,32], index: 2, kind: output, shape index: {}]  }
   0x1   :  { %8 = vsyncpa [#allocation6], 0 }
   0x2   :  { %9 = vsyncpa [#allocation4], 0  ;;  %s252_s9 = smov [#allocation2]   ;;  %s180_s13 = scalar_lea.hbm %s321_s0, 256 }
   0x3   :  { %s15_s10 = sshll.u32 %s252_s9, 4  ;;  %p181_p0 = scmp.ne.s32.totalorder %s321_s0, %s180_s13  ;;  %s16_s10 = int_to_ptr.vmem [resolvable:$true] %s15_s10 }
   0x4   :  { %p184_p1 = scmp.lt.u32.totalorder %s180_s13, %s321_s0 }
   0x6   :  { %p186_p2 = pnand %p184_p1, %p181_p0 }
   0x8   :  { %189 = shalt.err (!%p186_p2)
}
   0x9   :  { %s190_s18 = scalar_lea.vmem %s16_s10, 256  ;;  %p195_p4 = scmp.lt.s32.totalorder %s16_s10, %s16_s10 }
   0xa   :  { %p191_p3 = scmp.ne.s32.totalorder %s16_s10, %s190_s18  ;;  %p196_p5 = scmp.lt.s32.totalorder %s190_s18, %s190_s18 }
   0xc   :  { %p197_p6 = por %p196_p5, %p195_p4 }
   0xe   :  { %p198_p7 = pnand %p197_p6, %p191_p3 }
  0x10   :  { %201 = shalt.err (!%p198_p7)
}
  0x11   :  { %s253_s19 = smov 128   ;;  %s254_s20 = smov 8  }
  0x12   :  { %21 = dma.hbm_to_vmem [thread:$0]  %s321_s0, 256, %s16_s10, [#allocation3], %s253_s19, %s253_s19, %s254_s20  }
  0x13   :  { %s255_s23 = smov [#allocation5]   ;;  %s202_s27 = scalar_lea.hbm %s322_s1, 512 }
  0x14   :  { %s27_s24 = sshll.u32 %s255_s23, 4  ;;  %p203_p8 = scmp.ne.s32.totalorder %s322_s1, %s202_s27  ;;  %s28_s24 = int_to_ptr.vmem [resolvable:$true] %s27_s24 }
  0x15   :  { %p206_p9 = scmp.lt.u32.totalorder %s202_s27, %s322_s1 }
  0x17   :  { %p208_p10 = pnand %p206_p9, %p203_p8 }
  0x19   :  { %211 = shalt.err (!%p208_p10)
}
  0x1a   :  { %s212_s4 = scalar_lea.vmem %s28_s24, 512  ;;  %p217_p12 = scmp.lt.s32.totalorder %s28_s24, %s28_s24 }
  0x1b   :  { %p213_p11 = scmp.ne.s32.totalorder %s28_s24, %s212_s4  ;;  %p218_p13 = scmp.lt.s32.totalorder %s212_s4, %s212_s4 }
  0x1d   :  { %p219_p0 = por %p218_p13, %p217_p12 }
  0x1f   :  { %p220_p1 = pnand %p219_p0, %p213_p11 }
  0x21   :  { %223 = shalt.err (!%p220_p1)
}
  0x22   :  { %33 = dma.hbm_to_vmem [thread:$0]  %s322_s1, 512, %s28_s24, [#allocation6], %s253_s19, %s253_s19, %s254_s20  }
  0x23   :  { %246 = dma.done.wait [#allocation3], 256  }
  0x24   :  { %247 = vsyncadd [#allocation3], 4294967040 }
  0x25   :  { %248 = dma.done.wait [#allocation6], 512  }
  0x26   :  { %249 = vsyncadd [#allocation6], 4294966784  ;;  %vm46_vm0 = vcmask 261120   ;;  %v42_v0 = vld [vmem:[#allocation5] sm:$0xff]  ;;  %v43_v1 = vld [vmem:[#allocation5 + $0x8] sm:$0xff]  ;;  %s256_s1 = smov [#allocation7]  }
  0x27   :  { %v44_v2 = vld [vmem:[#allocation5 + $0x10] sm:$0xff]  ;;  %v167_v3 = vpack.c.bf16 %v43_v1, %v42_v0  ;;  %v45_v4 = vld [vmem:[#allocation5 + $0x18] sm:$0xff]  ;;  %s135_s6 = sshll.u32 %s256_s1, 4  ;;  %s136_s6 = int_to_ptr.vmem [resolvable:$true] %s135_s6 }
  0x28   :  { %v40_v5 = vld [vmem:[#allocation2] sm:$0xff]  ;;  %v171_v6 = vpack.c.bf16 %v45_v4, %v44_v2  ;;  %v41_v7 = vld [vmem:[#allocation2 + $0x8] sm:$0xff]  ;;  %s224_s7 = scalar_lea.vmem %s136_s6, 256  ;;  %p229_p3 = scmp.lt.s32.totalorder %s136_s6, %s136_s6 }
  0x29   :  { %164 = vmatprep.mubr.msk.f32.mxu0 %vm46_vm0, %v40_v5  ;;  %168 = vmatprep.subr.bf16.mxu0 %v167_v3  ;;  %p225_p2 = scmp.ne.s32.totalorder %s136_s6, %s224_s7  ;;  %p230_p4 = scmp.lt.s32.totalorder %s224_s7, %s224_s7 }
  0x2a   :  { %170 = vmatpush3.bf16.msra.mxu0 %v167_v3 }
  0x2b   :  { %172 = vmatprep.subr.bf16.mxu0 %v171_v6  ;;  %p231_p5 = por %p230_p4, %p229_p3 }
  0x2d   :  { %p232_p6 = pnand %p231_p5, %p225_p2 }
  0x2e   :  { %174 = vmatpush3.bf16.msra.mxu0 %v171_v6 }
  0x31   :  { %165 = vmatmul.mubr.msk.f32.vlgmr.msra.gmra.mrb[0].mxu0 %vm46_vm0, %v41_v7 }
 0x104   :  { %v166_v8 = vpop.f32.mrb[0].mxu0 }
 0x105   :  { %129 = vst.msk [vmem:[#allocation7 + $0x8] sm:$0xff] %vm46_vm0, %v166_v8  ;;  %v119_v9 = vpop.f32.mrb[1].mxu0 }
 0x106   :  { %128 = vst.msk [vmem:[#allocation7] sm:$0xff] %vm46_vm0, %v119_v9 }
 0x107   :  { %235 = shalt.err (!%p232_p6)
}
 0x108   :  { %s236_s10 = scalar_lea.hbm %s323_s2, 256 }
 0x109   :  { %p237_p7 = scmp.ne.s32.totalorder %s323_s2, %s236_s10  ;;  %p240_p8 = scmp.lt.u32.totalorder %s236_s10, %s323_s2 }
 0x10b   :  { %p242_p9 = pnand %p240_p8, %p237_p7 }
 0x10d   :  { %245 = shalt.err (!%p242_p9)
}
 0x10e   :  { %141 = dma.vmem_to_hbm [thread:$0]  %s136_s6, 256, %s323_s2, [#allocation4], %s253_s19, %s253_s19, %s254_s20  }
 0x10f   :  { %250 = dma.done.wait [#allocation4], 256  }
 0x110   :  { %251 = vsyncadd [#allocation4], 4294967040 }
 0x111   :  { %145 = vsyncpa [#allocation3], 1 }
 0x112   :  { %146 = vsyncpa [#allocation6], 1 }
 0x113   :  { %147 = vsyncpa [#allocation4], 1 }

// kernel: tpu_custom_call.1
= control target key start
LH: loop header
LB: loop body
LE: loop exit
PB: predicated region body
PF: predicated region fallthrough
CT: control target
= control target key end

     0   :  { %7 = vsyncpa [#allocation3], 0  ;;  %s321_s0 = inlined_call_operand.hbm [shape: f32[16,32], index: 0, kind: input, shape index: {}]   ;;  %s322_s1 = inlined_call_operand.hbm [shape: f32[32,32], index: 1, kind: input, shape index: {}]   ;;  %s323_s2 = inlined_call_operand.hbm [shape: f32[16,32], index: 2, kind: output, shape index: {}]  }
   0x1   :  { %8 = vsyncpa [#allocation6], 0 }
   0x2   :  { %9 = vsyncpa [#allocation4], 0  ;;  %s252_s9 = smov [#allocation2]   ;;  %s180_s13 = scalar_lea.hbm %s321_s0, 256 }
   0x3   :  { %s15_s10 = sshll.u32 %s252_s9, 4  ;;  %p181_p0 = scmp.ne.s32.totalorder %s321_s0, %s180_s13  ;;  %s16_s10 = int_to_ptr.vmem [resolvable:$true] %s15_s10 }
   0x4   :  { %p184_p1 = scmp.lt.u32.totalorder %s180_s13, %s321_s0 }
   0x6   :  { %p186_p2 = pnand %p184_p1, %p181_p0 }
   0x8   :  { %189 = shalt.err (!%p186_p2)
}
   0x9   :  { %s190_s18 = scalar_lea.vmem %s16_s10, 256  ;;  %p195_p4 = scmp.lt.s32.totalorder %s16_s10, %s16_s10 }
   0xa   :  { %p191_p3 = scmp.ne.s32.totalorder %s16_s10, %s190_s18  ;;  %p196_p5 = scmp.lt.s32.totalorder %s190_s18, %s190_s18 }
   0xc   :  { %p197_p6 = por %p196_p5, %p195_p4 }
   0xe   :  { %p198_p7 = pnand %p197_p6, %p191_p3 }
  0x10   :  { %201 = shalt.err (!%p198_p7)
}
  0x11   :  { %s253_s19 = smov 128   ;;  %s254_s20 = smov 8  }
  0x12   :  { %21 = dma.hbm_to_vmem [thread:$0]  %s321_s0, 256, %s16_s10, [#allocation3], %s253_s19, %s253_s19, %s254_s20  }
  0x13   :  { %s255_s23 = smov [#allocation5]   ;;  %s202_s27 = scalar_lea.hbm %s322_s1, 512 }
  0x14   :  { %s27_s24 = sshll.u32 %s255_s23, 4  ;;  %p203_p8 = scmp.ne.s32.totalorder %s322_s1, %s202_s27  ;;  %s28_s24 = int_to_ptr.vmem [resolvable:$true] %s27_s24 }
  0x15   :  { %p206_p9 = scmp.lt.u32.totalorder %s202_s27, %s322_s1 }
  0x17   :  { %p208_p10 = pnand %p206_p9, %p203_p8 }
  0x19   :  { %211 = shalt.err (!%p208_p10)
}
  0x1a   :  { %s212_s4 = scalar_lea.vmem %s28_s24, 512  ;;  %p217_p12 = scmp.lt.s32.totalorder %s28_s24, %s28_s24 }
  0x1b   :  { %p213_p11 = scmp.ne.s32.totalorder %s28_s24, %s212_s4  ;;  %p218_p13 = scmp.lt.s32.totalorder %s212_s4, %s212_s4 }
  0x1d   :  { %p219_p0 = por %p218_p13, %p217_p12 }
  0x1f   :  { %p220_p1 = pnand %p219_p0, %p213_p11 }
  0x21   :  { %223 = shalt.err (!%p220_p1)
}
  0x22   :  { %33 = dma.hbm_to_vmem [thread:$0]  %s322_s1, 512, %s28_s24, [#allocation6], %s253_s19, %s253_s19, %s254_s20  }
  0x23   :  { %246 = dma.done.wait [#allocation3], 256  }
  0x24   :  { %247 = vsyncadd [#allocation3], 4294967040 }
  0x25   :  { %248 = dma.done.wait [#allocation6], 512  }
  0x26   :  { %249 = vsyncadd [#allocation6], 4294966784  ;;  %vm46_vm0 = vcmask 261120   ;;  %v42_v0 = vld [vmem:[#allocation5] sm:$0xff]  ;;  %v43_v1 = vld [vmem:[#allocation5 + $0x8] sm:$0xff]  ;;  %s256_s1 = smov [#allocation7]  }
  0x27   :  { %v44_v2 = vld [vmem:[#allocation5 + $0x10] sm:$0xff]  ;;  %v167_v3 = vpack.c.bf16 %v43_v1, %v42_v0  ;;  %v45_v4 = vld [vmem:[#allocation5 + $0x18] sm:$0xff]  ;;  %s135_s6 = sshll.u32 %s256_s1, 4  ;;  %s136_s6 = int_to_ptr.vmem [resolvable:$true] %s135_s6 }
  0x28   :  { %v40_v5 = vld [vmem:[#allocation2] sm:$0xff]  ;;  %v171_v6 = vpack.c.bf16 %v45_v4, %v44_v2  ;;  %v41_v7 = vld [vmem:[#allocation2 + $0x8] sm:$0xff]  ;;  %s224_s7 = scalar_lea.vmem %s136_s6, 256  ;;  %p229_p3 = scmp.lt.s32.totalorder %s136_s6, %s136_s6 }
  0x29   :  { %164 = vmatprep.mubr.msk.f32.mxu0 %vm46_vm0, %v40_v5  ;;  %168 = vmatprep.subr.bf16.mxu0 %v167_v3  ;;  %p225_p2 = scmp.ne.s32.totalorder %s136_s6, %s224_s7  ;;  %p230_p4 = scmp.lt.s32.totalorder %s224_s7, %s224_s7 }
  0x2a   :  { %170 = vmatpush3.bf16.msra.mxu0 %v167_v3 }
  0x2b   :  { %172 = vmatprep.subr.bf16.mxu0 %v171_v6  ;;  %p231_p5 = por %p230_p4, %p229_p3 }
  0x2d   :  { %p232_p6 = pnand %p231_p5, %p225_p2 }
  0x2e   :  { %174 = vmatpush3.bf16.msra.mxu0 %v171_v6 }
  0x31   :  { %165 = vmatmul.mubr.msk.f32.vlgmr.msra.gmra.mrb[0].mxu0 %vm46_vm0, %v41_v7 }
 0x104   :  { %v166_v8 = vpop.f32.mrb[0].mxu0 }
 0x105   :  { %129 = vst.msk [vmem:[#allocation7 + $0x8] sm:$0xff] %vm46_vm0, %v166_v8  ;;  %v119_v9 = vpop.f32.mrb[1].mxu0 }
 0x106   :  { %128 = vst.msk [vmem:[#allocation7] sm:$0xff] %vm46_vm0, %v119_v9 }
 0x107   :  { %235 = shalt.err (!%p232_p6)
}
 0x108   :  { %s236_s10 = scalar_lea.hbm %s323_s2, 256 }
 0x109   :  { %p237_p7 = scmp.ne.s32.totalorder %s323_s2, %s236_s10  ;;  %p240_p8 = scmp.lt.u32.totalorder %s236_s10, %s323_s2 }
 0x10b   :  { %p242_p9 = pnand %p240_p8, %p237_p7 }
 0x10d   :  { %245 = shalt.err (!%p242_p9)
}
 0x10e   :  { %141 = dma.vmem_to_hbm [thread:$0]  %s136_s6, 256, %s323_s2, [#allocation4], %s253_s19, %s253_s19, %s254_s20  }
 0x10f   :  { %250 = dma.done.wait [#allocation4], 256  }
 0x110   :  { %251 = vsyncadd [#allocation4], 4294967040 }
 0x111   :  { %145 = vsyncpa [#allocation3], 1 }
 0x112   :  { %146 = vsyncpa [#allocation6], 1 }
 0x113   :  { %147 = vsyncpa [#allocation4], 1 }

</bundles_post_ra>
